<compile_context>
chip_gen: v7x
topology: tpu7x:2x2x1
jax: 0.10.0
libtpu: 0.0.40
codegen_flags: <defaults>
</compile_context>

<pallas_src>
import math

import jax
import jax.numpy as jnp
from jax.experimental import pallas as pl
from jax.experimental.pallas import tpu as pltpu


# ----------------------------------------------------------------------------
# Single Pallas pass: skinny 3-tap conv (one matmul on the im2col'd input tile)
# followed by the precomputed BatchNorm affine.  Output is written once.
# ----------------------------------------------------------------------------
def conv_bn_kernel(xc_ref, w_ref, scale_ref, shift_ref, o_ref):
    # xc_ref:    (1, TL, 3*C_in)  im2col'd input tile
    # w_ref:     (3*C_in, Dp)     conv taps flattened into rows (zero-padded to Dp)
    # scale_ref: (1, Dp)          gamma * rsqrt(var + eps)
    # shift_ref: (1, Dp)          (conv_bias - mean) * scale + beta
    # o_ref:     (1, TL, Dp)
    y = jnp.dot(xc_ref[0], w_ref[...], preferred_element_type=jnp.float32)
    o_ref[0] = (y * scale_ref[0] + shift_ref[0]).astype(o_ref.dtype)


# ----------------------------------------------------------------------------
# Wrapper helpers
# ----------------------------------------------------------------------------
def _tpu_vmem_capacity_bytes():
    try:
        return int(pltpu.get_tpu_info().vmem_capacity_bytes)
    except Exception:
        return 64 * 1024 * 1024  # conservative default (v7x per-TensorCore)


def _choose_l_tile(L, d_pad, target_bytes):
    """Multiple-of-8 row tile sized for bandwidth; grid uses pl.cdiv, so the tile
    does not have to divide L (partial boundary blocks are handled by Pallas)."""
    if L <= 8:
        return L  # full extent (always legal)
    rows = max(8, target_bytes // (4 * max(d_pad, 1)))
    rows = min(rows, L)
    return max(8, (rows // 8) * 8)


def _vmem_limit(per_step_bytes, vmem_cap):
    # 128 MiB parts (v5e/v6e) -> allow up to 64 MiB scoped; 64 MiB parts (v7x) -> 48 MiB.
    cap = 64 * 1024 * 1024 if vmem_cap >= 100 * 1024 * 1024 else 48 * 1024 * 1024
    need = 2 * per_step_bytes  # double-buffered pipeline
    return int(min(max(2 * need, 32 * 1024 * 1024), cap))


# ----------------------------------------------------------------------------
# Wrapper
# ----------------------------------------------------------------------------
def token_embedding(x, w, b, gamma, beta, *, eps=1e-5, out_dtype=jnp.float32):
    """x: (B, L, C_in).  w: (3, C_in, D) taps ordered [x[l-1], x[l], x[l+1]].
    b, gamma, beta: (1, D).  Returns (B, L, D) == Conv1d(k=3, pad=1) -> BatchNorm1d
    normalized with training-mode (current-batch) statistics."""
    B, L, C_in = x.shape
    D = w.shape[-1]
    K = 3 * C_in

    # ---- im2col along L (tiny: 3*C_in channels); handles the k=3 halo so the
    #      Pallas grid tiles L with plain non-overlapping blocks. ------------------
    zero = jnp.zeros((B, 1, C_in), x.dtype)
    x_cat = jnp.concatenate(
        [jnp.concatenate([zero, x[:, :-1, :]], axis=1),   # x[l-1] (zero-padded)
         x,                                               # x[l]
         jnp.concatenate([x[:, 1:, :], zero], axis=1)],   # x[l+1] (zero-padded)
        axis=-1).astype(jnp.float32)                      # (B, L, 3*C_in)
    w_flat = w.reshape(K, D).astype(jnp.float32)

    # ---- BatchNorm batch statistics from sufficient statistics of x_cat ----------
    # Conv is linear: sum / sum-of-squares of y = x_cat @ W + b are derived from the
    # row-sum s and the tiny K x K Gram matrix G.  No full-size stats pass needed.
    N = jnp.float32(B * L)
    xf = x_cat.reshape(B * L, K)
    s = jnp.sum(xf, axis=0)                                         # (K,)
    G = jnp.dot(xf.T, xf, preferred_element_type=jnp.float32)       # (K, K)
    ws = jnp.dot(s, w_flat)                                         # (D,) = W^T s
    quad = jnp.sum(w_flat * jnp.dot(G, w_flat), axis=0)             # (D,) = diag(W^T G W)
    bb = b.reshape(D).astype(jnp.float32)
    sum_y = ws + N * bb
    sumsq_y = quad + 2.0 * bb * ws + N * bb * bb
    mean = sum_y / N
    var = jnp.maximum(sumsq_y / N - mean * mean, 0.0)   # clamp: cancellation safety
    inv = jax.lax.rsqrt(var + eps)
    scale_v = gamma.reshape(D).astype(jnp.float32) * inv            # (D,)
    shift_v = (bb - mean) * scale_v + beta.reshape(D).astype(jnp.float32)

    # ---- Pad d_model to a multiple of 128 for lane-dense (unmasked) output stores.
    #      Padded columns are all-zero -> padded outputs are exactly 0, sliced off.
    Dp = ((D + 127) // 128) * 128
    if Dp != D:
        pad = Dp - D
        w_flat = jnp.pad(w_flat, ((0, 0), (0, pad)))
        scale_v = jnp.pad(scale_v, (0, pad))
        shift_v = jnp.pad(shift_v, (0, pad))
    scale = scale_v.reshape(1, Dp)
    shift = shift_v.reshape(1, Dp)

    # ---- Tiling (generation-aware tile target / VMEM limit) ----------------------
    vmem_cap = _tpu_vmem_capacity_bytes()
    target_tile = 8 * 1024 * 1024 if vmem_cap >= 100 * 1024 * 1024 else 6 * 1024 * 1024
    TL = _choose_l_tile(L, Dp, target_tile)
    nL = pl.cdiv(L, TL)

    blk_x = TL * K * 4
    blk_y = TL * Dp * 4
    blk_w = K * Dp * 4
    per_step = blk_x + blk_y + blk_w + 2 * Dp * 4

    out = pl.pallas_call(
        conv_bn_kernel,
        out_shape=jax.ShapeDtypeStruct((B, L, Dp), out_dtype),
        grid_spec=pltpu.PrefetchScalarGridSpec(
            num_scalar_prefetch=0,
            grid=(B, nL),
            in_specs=[
                pl.BlockSpec((1, TL, K), lambda i, j: (i, j, 0)),
                pl.BlockSpec((K, Dp), lambda i, j: (0, 0)),
                pl.BlockSpec((1, Dp), lambda i, j: (0, 0)),
                pl.BlockSpec((1, Dp), lambda i, j: (0, 0)),
            ],
            out_specs=pl.BlockSpec((1, TL, Dp), lambda i, j: (i, j, 0)),
        ),
        compiler_params=pltpu.CompilerParams(
            dimension_semantics=("parallel", "parallel"),
            vmem_limit_bytes=_vmem_limit(per_step, vmem_cap)),
    )(x_cat, w_flat, scale, shift)

    if Dp != D:
        out = out[..., :D]
    return out


# ----------------------------------------------------------------------------
# Pure-JAX reference (for a correctness check)
# ----------------------------------------------------------------------------
def token_embedding_ref(x, w, b, gamma, beta, *, eps=1e-5):
    xc = jnp.transpose(x, (0, 2, 1))                       # (B, C_in, L)
    w_oih = jnp.transpose(w, (2, 1, 0))                    # (D, C_in, 3)
    y = jax.lax.conv_general_dilated(
        xc, w_oih, window_strides=(1,), padding=((1, 1),),
        dimension_numbers=("NCH", "OIH", "NCH"))
    y = y + b[0][None, :, None]                            # (B, D, L)
    mean = jnp.mean(y, axis=(0, 2))
    var = jnp.var(y, axis=(0, 2))                          # biased, like BN training
    yn = (y - mean[None, :, None]) * jax.lax.rsqrt(var + eps)[None, :, None]
    yn = yn * gamma[0][None, :, None] + beta[0][None, :, None]
    return jnp.transpose(yn, (0, 2, 1))                    # (B, L, D)


if __name__ == "__main__":
    B, L, C_in, D = 2, 16, 4, 32

    key = jax.random.PRNGKey(0)
    kx, kw, kb = jax.random.split(key, 3)

    # Input (B, L, C_in) -- same layout the PyTorch module receives.
    x = jax.random.normal(kx, (B, L, C_in), dtype=jnp.float32)

    # Conv weight: kaiming_normal_(fan_in, leaky_relu) -> std = gain / sqrt(fan_in).
    fan_in = C_in * 3
    gain = math.sqrt(2.0 / (1.0 + 0.01 ** 2))
    std = gain / math.sqrt(fan_in)
    w = std * jax.random.normal(kw, (3, C_in, D), dtype=jnp.float32)  # (taps, C_in, D)
    # Conv bias: default PyTorch init U(-1/sqrt(fan_in), 1/sqrt(fan_in)).
    bound = 1.0 / math.sqrt(fan_in)
    b = jax.random.uniform(kb, (1, D), minval=-bound, maxval=bound, dtype=jnp.float32)

    # BatchNorm affine params (default init).
    gamma = jnp.ones((1, D), dtype=jnp.float32)
    beta = jnp.zeros((1, D), dtype=jnp.float32)

    # TODO(synk): BatchNorm running_mean/running_var buffer updates (training-mode side
    # effect) are not reproduced; only the forward output is computed.
    out = token_embedding(x, w, b, gamma, beta)
    out = jax.block_until_ready(out)

    ref = token_embedding_ref(x, w, b, gamma, beta)
    assert out.shape == (B, L, D)
    assert jnp.allclose(out, ref, atol=1e-4, rtol=1e-4), "mismatch vs reference"

    print("KERNEL_OK")
</pallas_src>

<mosaic_0001>
module attributes {stable_mosaic.version = 11 : i64} {
  func.func @conv_bn_kernel(%arg0: i32, %arg1: i32, %arg2: memref<1x16x12xf32, #tpu.memory_space<vmem>>, %arg3: memref<12x128xf32, #tpu.memory_space<vmem>>, %arg4: memref<1x128xf32, #tpu.memory_space<vmem>>, %arg5: memref<1x128xf32, #tpu.memory_space<vmem>>, %arg6: memref<1x16x128xf32, #tpu.memory_space<vmem>>) attributes {dimension_semantics = [#tpu.dimension_semantics<parallel>, #tpu.dimension_semantics<parallel>], iteration_bounds = array<i64: 2, 1>, scalar_prefetch = 0 : i64, scratch_operands = 0 : i64, tpu.core_type = #tpu.core_type<tc>, window_params = [{transform_indices = @transform_0, window_bounds = array<i64: 1, 16, 12>}, {pipeline_mode = #tpu.pipeline_mode<synchronous>, transform_indices = @transform_1, window_bounds = array<i64: 12, 128>}, {pipeline_mode = #tpu.pipeline_mode<synchronous>, transform_indices = @transform_2, window_bounds = array<i64: 1, 128>}, {pipeline_mode = #tpu.pipeline_mode<synchronous>, transform_indices = @transform_3, window_bounds = array<i64: 1, 128>}, {transform_indices = @transform_4, window_bounds = array<i64: 1, 16, 128>}]} {
    %c0 = arith.constant 0 : index
    %c0_0 = arith.constant 0 : index
    %c0_1 = arith.constant 0 : index
    %0 = vector.load %arg2[%c0, %c0_0, %c0_1] : memref<1x16x12xf32, #tpu.memory_space<vmem>>, vector<1x16x12xf32>
    %1 = vector.shape_cast %0 : vector<1x16x12xf32> to vector<16x12xf32>
    %c0_2 = arith.constant 0 : index
    %c0_3 = arith.constant 0 : index
    %2 = vector.load %arg3[%c0_2, %c0_3] : memref<12x128xf32, #tpu.memory_space<vmem>>, vector<12x128xf32>
    %cst = arith.constant dense<0.000000e+00> : vector<16x128xf32>
    %3 = tpu.matmul %1, %2, %cst {dimension_numbers = #tpu.dot_dimension_numbers<[1], [0], [0], [1], [0, 0, 1, 1], [], []>} : vector<16x12xf32>, vector<12x128xf32>, vector<16x128xf32> -> vector<16x128xf32>
    %c0_4 = arith.constant 0 : index
    %c0_5 = arith.constant 0 : index
    %4 = vector.load %arg4[%c0_4, %c0_5] : memref<1x128xf32, #tpu.memory_space<vmem>>, vector<1x128xf32>
    %5 = vector.shape_cast %4 : vector<1x128xf32> to vector<128xf32>
    %6 = vector.shape_cast %5 : vector<128xf32> to vector<1x128xf32>
    %7 = vector.broadcast %6 : vector<1x128xf32> to vector<16x128xf32>
    %8 = arith.mulf %3, %7 : vector<16x128xf32>
    %c0_6 = arith.constant 0 : index
    %c0_7 = arith.constant 0 : index
    %9 = vector.load %arg5[%c0_6, %c0_7] : memref<1x128xf32, #tpu.memory_space<vmem>>, vector<1x128xf32>
    %10 = vector.shape_cast %9 : vector<1x128xf32> to vector<128xf32>
    %11 = vector.shape_cast %10 : vector<128xf32> to vector<1x128xf32>
    %12 = vector.broadcast %11 : vector<1x128xf32> to vector<16x128xf32>
    %13 = arith.addf %8, %12 : vector<16x128xf32>
    %c0_8 = arith.constant 0 : index
    %c0_9 = arith.constant 0 : index
    %c0_10 = arith.constant 0 : index
    %14 = vector.load %arg6[%c0_8, %c0_9, %c0_10] : memref<1x16x128xf32, #tpu.memory_space<vmem>>, vector<1x16x128xf32>
    %15 = vector.shape_cast %14 : vector<1x16x128xf32> to vector<16x128xf32>
    %16 = vector.shape_cast %13 : vector<16x128xf32> to vector<1x16x128xf32>
    tpu.vector_store %arg6[%c0_8, %c0_9, %c0_10], %16 {strides = array<i32>} : memref<1x16x128xf32, #tpu.memory_space<vmem>>, vector<1x16x128xf32>,
    return
  }
  func.func @transform_0(%arg0: i32, %arg1: i32) -> (i32, i32, i32) {
    %c0_i32 = arith.constant 0 : i32
    %c0_i32_0 = arith.constant 0 : i32
    return %arg0, %arg1, %c0_i32 : i32, i32, i32
  }
  func.func @transform_1(%arg0: i32, %arg1: i32) -> (i32, i32) {
    %c0_i32 = arith.constant 0 : i32
    %c0_i32_0 = arith.constant 0 : i32
    %c0_i32_1 = arith.constant 0 : i32
    return %c0_i32, %c0_i32_0 : i32, i32
  }
  func.func @transform_2(%arg0: i32, %arg1: i32) -> (i32, i32) {
    %c0_i32 = arith.constant 0 : i32
    %c0_i32_0 = arith.constant 0 : i32
    %c0_i32_1 = arith.constant 0 : i32
    return %c0_i32, %c0_i32_0 : i32, i32
  }
  func.func @transform_3(%arg0: i32, %arg1: i32) -> (i32, i32) {
    %c0_i32 = arith.constant 0 : i32
    %c0_i32_0 = arith.constant 0 : i32
    %c0_i32_1 = arith.constant 0 : i32
    return %c0_i32, %c0_i32_0 : i32, i32
  }
  func.func @transform_4(%arg0: i32, %arg1: i32) -> (i32, i32, i32) {
    %c0_i32 = arith.constant 0 : i32
    %c0_i32_0 = arith.constant 0 : i32
    return %arg0, %arg1, %c0_i32 : i32, i32, i32
  }
}

</mosaic_0001>

<bundles_post_ra>
// kernel: tpu_custom_call.1
= control target key start
LH: loop header
LB: loop body
LE: loop exit
PB: predicated region body
PF: predicated region fallthrough
CT: control target
= control target key end

     0   :  { %9 = vsyncpa [#allocation3], 0  ;;  %s763_s0 = inlined_call_operand.vmem [shape: f32[2,16,12], index: 0, kind: input, shape index: {}]   ;;  %s764_s1 = inlined_call_operand.vmem [shape: f32[12,128], index: 1, kind: input, shape index: {}]   ;;  %s765_s2 = inlined_call_operand.vmem [shape: f32[1,128], index: 2, kind: input, shape index: {}]   ;;  %s766_s3 = inlined_call_operand.vmem [shape: f32[1,128], index: 3, kind: input, shape index: {}]   ;;  %s767_s4 = inlined_call_operand.hbm [shape: f32[2,16,128], index: 4, kind: output, shape index: {}]  }
   0x1   :  { %11 = vsyncpa [#allocation3 + $0x1], 0  ;;  %s636_s15 = smov 0   ;;  %s638_s16 = smov 0  }
   0x2   :  { %s640_s17 = smov 0   ;;  %s642_s18 = smov 0  }
   0x3   :  { %s644_s19 = smov 0   ;;  %s646_s20 = smov 0  }
   0x4 LB: > { %s432_s21 = sadd.s32 4294967295, %s605_s20   ;;  %s433_s22 = sadd.s32 4294967294, %s605_s20   ;;  %s605_s20 = sphi %s646_s20, %s17_s20   ;;  %s601_s19 = sphi %s644_s19, %s774_s19   ;;  %s597_s18 = sphi %s642_s18, %s773_s18   ;;  %s593_s17 = sphi %s640_s17, %s772_s17   ;;  %s589_s16 = sphi %s638_s16, %s771_s16   ;;  %s585_s15 = sphi %s636_s15, %s770_s15  }
   0x5   : > { %s29_s23 = sadd.s32 1, %s601_s19  ;;  %s129_s24 = sadd.s32 1, %s593_s17 }
   0x6   : > { %p31_p0 = scmp.ge.s32.totalorder %s29_s23, 2  ;;  %p139_p1 = scmp.ne.s32.totalorder %s593_s17, %s589_s16 }
   0x7   : > { %p140_p2 = scmp.eq.s32.totalorder %s432_s21, 1  ;;  %p145_p3 = scmp.ne.s32.totalorder %s589_s16, %s585_s15 }
   0x8   : > { %s776_s23 = smov (%p31_p0, %s29_s23), 0  ;;  %p146_p5 = scmp.eq.s32.totalorder %s433_s22, 1 }
   0x9   : > { %p676_p4 = por %p140_p2, %p139_p1  ;;  %s124_s26 = ssub.s32 %s601_s19, %s776_s23 }
   0xa   : > { %p436_p6 = scmp.ge.s32.totalorder %s605_s20, 1  ;;  %p127_p7 = scmp.eq.s32.totalorder %s124_s26, 0 }
   0xb   : > { %p683_p8 = por %p146_p5, %p145_p3  ;;  %p186_p9 = scmp.lt.s32.totalorder %s605_s20, 3 }
   0xc   : > { %s689_s28 = scalar_select %p127_p7, %s593_s17, %s129_s24  }
   0xd   : > { %p187_p10 = pnand %p436_p6, %p186_p9 }
   0xe   : > { %v229_v0 = vld [vmem:[%s764_s1] sm:$0xff] (!%p187_p10)  ;;  %v230_v1 = vld [vmem:[%s764_s1 + $0x8] sm:$0xf] (!%p187_p10)  ;;  %vm238_vm0 = vcmask (!%p187_p10), 1043456   ;;  %p217_p11 = scmp.lt.s32.totalorder (!%p187_p10), %s597_s18, 1  ;;  %vm607_vm1 = vmmov (!%p187_p10), 1  }
   0xf   : > { %190 = sbr.rel (%p187_p10) target bundleno = 260 (0x104), region = 36  ;;  %v463_v2 = vpack.c.bf16 (!%p187_p10), %v230_v1, %v229_v0  ;;  %vm464_vm2 = vmpackc.low (!%p187_p10), %vm238_vm0, %vm607_vm1  ;;  %vm231_vm3 = vcmask (!%p187_p10), 97280   ;;  %s213_s12 = sand.u32 (!%p187_p10), 1, %s589_s16   ;;  %v443_v5 = vld [vmem:[%s765_s2] ss:$0 sm:$0xff] (!%p187_p10) }
  0x10   : > { %s437_s13 = sshll.u32 (!%p187_p10), %s213_s12, 4  ;;  %v444_v7 = vld [vmem:[%s766_s3] ss:$0 sm:$0xff] (!%p187_p10)  ;;  %s451_s30 = sshll.u32 (!%p187_p10), %s597_s18, 8 }
  0x11   : > { %465 = vmatprep.subr.msk.bf16.mxu0 (!%p187_p10), %vm464_vm2, %v463_v2  ;;  %s215_s26 = scalar_lea.vmem (!%p187_p10), [#allocation2], %s437_s13  ;;  %s608_s9 = smov (!%p187_p10), [#allocation2]  }
  0x12   : > { %468 = vmatpush3.bf16.msk.msra.mxu0 (!%p187_p10), %vm464_vm2, %v463_v2  ;;  %s353_s29 = sshll.u32 (!%p187_p10), %s215_s26, 4  ;;  %s531_s10 = sshll.u32 (!%p187_p10), %s608_s9, 4  ;;  %s710_s29 = int_to_ptr.vmem [resolvable:$true] %s353_s29  ;;  %s532_s10 = int_to_ptr.vmem [resolvable:$false] %s531_s10 }
  0x13   : > { %p534_p1 = scmp.lt.s32.totalorder (!%p187_p10), %s710_s29, %s532_s10 }
  0x16   : > { %s218_s7 = scalar_select %p217_p11, %s597_s18, 1 }
  0x17   : > { %s527_s18 = scalar_lea.vmem %s710_s29, 256 }
  0x18   : > { %s450_s8 = sshll.u32 %s218_s7, 4  ;;  %s715_s7 = scalar_lea.hbm %s767_s4, %s451_s30 }
  0x19   : > { %s224_s11 = scalar_lea.vmem %s763_s0, %s450_s8  ;;  %s717_s8 = scalar_lea.sflag [#allocation3], %s213_s12 }
  0x1a   : > { %v227_v3 = vld [vmem:[%s224_s11] sm:$0xff]  ;;  %v228_v4 = vld [vmem:[%s224_s11 + $0x8] sm:$0xff]  ;;  %p528_p12 = scmp.ne.s32.totalorder %s710_s29, %s527_s18  ;;  %s533_s11 = scalar_lea.vmem %s532_s10, 512 }
  0x1b   : > { %460 = vmatprep.mubr.msk.f32.mxu0 %vm231_vm3, %v227_v3  ;;  %p535_p2 = scmp.lt.s32.totalorder %s533_s11, %s527_s18 }
  0x1c   : > { %461 = vmatmul.mubr.msk.f32.vlgmr.msra.gmra.mrb[0].mxu0 %vm231_vm3, %v228_v4  ;;  %p529_p13 = pnand %p528_p12, %p676_p4 }
  0x1d   : > { %p536_p3 = por %p535_p2, %p534_p1 }
  0x1e   : > { %p530_p0 = pneg %p529_p13 }
  0x20   : > { %p537_p5 = pnand %p536_p3, %p530_p0 }
  0xef   : > { %v462_v6 = vpop.f32.mrb[0].mxu0 }
  0xf0   : > { %v325_v8 = vmul.f32 %v462_v6, %v443_v5  ;;  %v308_v9 = vpop.f32.mrb[1].mxu0 }
  0xf1   : > { %v324_v10 = vmul.f32 %v443_v5, %v308_v9 }
  0xf2   : > { %v334_v11 = vadd.f32 %v444_v7, %v325_v8 }
  0xf3   : > { %v333_v12 = vadd.f32 %v444_v7, %v324_v10 }
  0xf4   : > { %336 = vst [vmem:[%s215_s26 + $0x8] sm:$0xff] %v334_v11 }
  0xf5   : > { %335 = vst [vmem:[%s215_s26] sm:$0xff] %v333_v12 }
  0xf6   : > { %540 = shalt.err (!%p537_p5)
}
  0xf7   : > { %s541_s12 = scalar_lea.hbm %s715_s7, 256  ;;  %s545_s21 = scalar_lea.hbm %s767_s4, 512 }
  0xf8   : > { %p542_p6 = scmp.ne.s32.totalorder %s715_s7, %s541_s12  ;;  %p546_p10 = scmp.lt.u32.totalorder %s715_s7, %s767_s4 }
  0xf9   : > { %p547_p11 = scmp.lt.u32.totalorder %s545_s21, %s541_s12  ;;  %p549_p13 = scmp.lt.u32.totalorder %s541_s12, %s715_s7 }
  0xfa   : > { %p543_p7 = pnand %p542_p6, %p676_p4 }
  0xfb   : > { %p548_p12 = por %p547_p11, %p546_p10 }
  0xfc   : > { %p544_p9 = pneg %p543_p7 }
  0xfd   : > { %p550_p0 = por %p549_p13, %p548_p12 }
  0xff   : > { %p551_p1 = pnand %p550_p0, %p544_p9 }
 0x101   : > { %554 = shalt.err (!%p551_p1)
}
 0x102   : > { %s609_s26 = smov 128   ;;  %s610_s30 = smov 8  }
 0x103   : > { %469 = dma.vmem_to_hbm [thread:$0]  (%p676_p4), %s710_s29, 256, %s715_s7, %s717_s8, %s609_s26, %s609_s26, %s610_s30  }
 0x104 PF: > { %p475_p2 = scmp.ge.s32.totalorder %s605_s20, 2  ;;  %s368_s5 = sand.u32 1, %s585_s15  }
 0x105   : > { %s369_s6 = scalar_lea.sflag [#allocation3], %s368_s5 }
 0x106   : > { %p472_p3 = pnand %p475_p2, %p683_p8 }
 0x108   : > { %580 = dma.done.wait (!%p472_p3), %s369_s6, 256  }
 0x109   : > { %582 = vsyncadd (!%p472_p3), %s369_s6, 4294967040  ;;  %s17_s20 = sadd.s32 1, %s605_s20   ;;  %s770_s15 = smov %s589_s16 }
 0x10a   : > { %p14_p5 = scmp.ge.s32.totalorder %s17_s20, 4   ;;  %s771_s16 = smov %s593_s17 }
 0x10b   : > { %s772_s17 = smov %s689_s28  ;;  %s773_s18 = smov %s601_s19 }
 0x10c   : > { %s774_s19 = smov %s776_s23  ;;  %16 = sbr.rel (!%p14_p5) target bundleno = 4 (0x4), region = 71 }
 0x113   :  { %374 = vsyncpa [#allocation3], 1 }
 0x114   :  { %376 = vsyncpa [#allocation3 + $0x1], 1 }

</bundles_post_ra>
